<compile_context>
chip_gen: v7x
topology: tpu7x:2x2x1
jax: 0.10.0
libtpu: 0.0.40
codegen_flags: <defaults>
</compile_context>

<pallas_src>
import jax
import jax.numpy as jnp
from jax.experimental import pallas as pl
from jax.experimental.pallas import tpu as pltpu

LANE = 128  # vreg lane width; padded width of every fused layer / output slab


# ----------------------------- Pallas kernel --------------------------------
def _make_fused_kernel(n_later: int,
                       compute_dtype=jnp.bfloat16,
                       acc_dtype=jnp.float32):
    """Fused kernel: shared layer 1 + `n_later` fused later depths.

    Ref order: x, w1, b1, w_later (n_later,128,128), b_later (n_later,1,128), out.
    """
    assert n_later >= 1

    def kernel(x_ref, w1_ref, b1_ref, wl_ref, bl_ref, out_ref):
        # Depth 1 (all heads): bf16 MXU matmul, f32 accumulation.
        h = jnp.dot(x_ref[...].astype(compute_dtype), w1_ref[...],
                    preferred_element_type=acc_dtype) + b1_ref[...]
        h = jnp.maximum(h, 0.0)

        out = None
        for d in range(n_later):                      # static, fully unrolled
            z = jnp.dot(h.astype(compute_dtype), wl_ref[d],
                        preferred_element_type=acc_dtype) + bl_ref[d]
            # Final-logit columns are disjoint per depth; hidden columns are
            # don't-care in the output slab, so a plain sum is enough.
            out = z if out is None else out + z
            if d + 1 < n_later:
                h = jnp.maximum(z, 0.0)               # ReLU only for layers that continue

        out_ref[...] = out.astype(out_ref.dtype)      # one lane-dense (B,128) store

    return kernel


# --------------------------- Parameter packing -------------------------------
def pack_hard_heads_params(params_by_head, head_order, weight_dtype=jnp.bfloat16):
    """Pack PyTorch-layout (out, in) per-head params into the fused layout.

    Returns (packed, out_cols, n_later) where
      packed   = [w1 (in_f,128) bf16, b1 (1,128) f32,
                  w_later (n_later,128,128) bf16, b_later (n_later,1,128) f32]
      out_cols = {head: (col_start, col_stop)} inside the (B,128) output slab.
    """
    heads = [params_by_head[n] for n in head_order]
    n_layers = [len(h) for h in heads]
    for name, nl in zip(head_order, n_layers):
        # A 1-layer head would get its logits ReLU'd by the shared layer-1 ReLU.
        assert nl >= 2, f"head '{name}' must have >= 2 linear layers (got {nl})"
    depth_max = max(n_layers)
    n_later = depth_max - 1

    in_f = heads[0][0][0].shape[1]
    assert all(params_by_head[n][0][0].shape[1] == in_f for n in head_order)

    out_feats = {n: params_by_head[n][-1][0].shape[0] for n in head_order}
    total_out = sum(out_feats.values())
    assert total_out <= LANE, "total head outputs exceed 128 lanes"
    out_base = LANE - total_out                      # final logits live in [out_base, 128)

    out_cols, cur = {}, out_base
    for name in head_order:
        out_cols[name] = (cur, cur + out_feats[name])
        cur += out_feats[name]

    # ---- depth 1: all heads fused; hidden columns packed from column 0 ----
    w1 = jnp.zeros((in_f, LANE), jnp.float32)
    b1 = jnp.zeros((1, LANE), jnp.float32)
    col = 0
    col_off, col_w = {}, {}                          # activation layout of current depth
    for name in head_order:
        w, b = params_by_head[name][0]
        o = w.shape[0]
        w1 = w1.at[:, col:col + o].set(w.T)          # pre-transposed to (K, N)
        b1 = b1.at[0, col:col + o].set(b)
        col_off[name], col_w[name] = col, o
        col += o
    assert col <= LANE, "fused layer-1 hidden width exceeds 128 lanes"

    # ---- later depths: one fused (128,128) weight per depth ----
    w_later, b_later = [], []
    for d in range(1, depth_max):
        wd = jnp.zeros((LANE, LANE), jnp.float32)
        bd = jnp.zeros((1, LANE), jnp.float32)
        hid_col = 0
        new_off, new_w = {}, {}
        for name in head_order:
            layers = params_by_head[name]
            if d >= len(layers):
                continue
            w, b = layers[d]
            o, i = w.shape
            r0 = col_off[name]
            assert i == col_w[name]
            if d == len(layers) - 1:                 # final layer -> global output cols
                c0, c1 = out_cols[name]
                assert c1 - c0 == o
            else:                                    # continuing -> hidden cols from 0
                c0, c1 = hid_col, hid_col + o
                hid_col += o
                new_off[name], new_w[name] = c0, o
            wd = wd.at[r0:r0 + i, c0:c1].set(w.T)
            bd = bd.at[0, c0:c1].set(b)
        assert hid_col <= out_base, "hidden columns collide with output columns"
        col_off, col_w = new_off, new_w
        w_later.append(wd)
        b_later.append(bd)

    packed = [w1.astype(weight_dtype), b1,
              jnp.stack(w_later).astype(weight_dtype), jnp.stack(b_later)]
    return packed, out_cols, n_later


# ------------------------------ Forward wrapper -------------------------------
def make_hard_heads_forward(head_order, out_cols, n_later, *, batch_tile=256):
    kernel = _make_fused_kernel(n_later)

    def _call(xp, packed):
        bsz, in_f = xp.shape
        w1, b1, wl, bl = packed
        flops = 2 * bsz * (int(w1.shape[0]) * int(w1.shape[1])
                           + n_later * LANE * LANE)
        bytes_accessed = int(
            xp.size * xp.dtype.itemsize
            + sum(int(p.size) * p.dtype.itemsize for p in packed)
            + bsz * LANE * xp.dtype.itemsize)
        ce = pl.CostEstimate(flops=flops, transcendentals=0,
                             bytes_accessed=bytes_accessed)
        out_shape = jax.ShapeDtypeStruct((bsz, LANE), xp.dtype)

        if bsz > batch_tile and bsz % batch_tile == 0:
            # Large batch: shard rows across TensorCores (v7x megacore).
            in_specs = [
                pl.BlockSpec((batch_tile, in_f), lambda i: (i, 0)),
                pl.BlockSpec(w1.shape, lambda i: (0, 0)),
                pl.BlockSpec(b1.shape, lambda i: (0, 0)),
                pl.BlockSpec(wl.shape, lambda i: (0, 0, 0)),
                pl.BlockSpec(bl.shape, lambda i: (0, 0, 0)),
            ]
            out_specs = pl.BlockSpec((batch_tile, LANE), lambda i: (i, 0))
            return pl.pallas_call(
                kernel,
                out_shape=out_shape,
                grid=(bsz // batch_tile,),
                in_specs=in_specs,
                out_specs=out_specs,
                compiler_params=pltpu.CompilerParams(
                    dimension_semantics=("parallel",)),
                cost_estimate=ce,
            )(xp, *packed)

        # Small batch: single block, grid-less, everything resident in VMEM.
        return pl.pallas_call(kernel, out_shape=out_shape,
                              cost_estimate=ce)(xp, *packed)

    def forward(x, packed):
        bsz = x.shape[0]
        pad = (-bsz) % 16                      # full bf16 sublane tile
        xp = jnp.pad(x, ((0, pad), (0, 0))) if pad else x
        out = _call(xp, packed)
        return {name: out[:bsz, c0:c1] for name, (c0, c1) in out_cols.items()}

    return jax.jit(forward)


# --------------------------- Parameter construction --------------------------
def _init_linear(key, out_f: int, in_f: int):
    """Deterministic PyTorch-style uniform init: U(-1/sqrt(in), 1/sqrt(in))."""
    kw, kb = jax.random.split(key)
    bound = 1.0 / jnp.sqrt(jnp.float32(in_f))
    w = jax.random.uniform(kw, (out_f, in_f), jnp.float32, -bound, bound)
    b = jax.random.uniform(kb, (out_f,), jnp.float32, -bound, bound)
    return w, b


def build_head_params(key, in_features: int, neurons_list, features: int):
    """Mirror HardHeads.build_head layer structure (dropout = identity)."""
    dims = [in_features] + [n for (n, _drop) in neurons_list] + [features]
    keys = jax.random.split(key, len(dims) - 1)
    return [_init_linear(keys[i], dims[i + 1], dims[i])
            for i in range(len(dims) - 1)]


# ----------------------------------- Main ------------------------------------
if __name__ == "__main__":
    in_features = 32
    n_tricks = 10
    trick_name_cfg = [(64, 0.1), (32, 0.1)]
    landed_cfg = [(32, 0.2)]
    stance_cfg = [(32, 0.2)]
    batch = 16                                     # one full bf16 sublane tile

    root = jax.random.PRNGKey(0)
    k_x, k_t, k_l, k_s, k_x2 = jax.random.split(root, 5)

    params = {
        "trick_name": build_head_params(k_t, in_features, trick_name_cfg, n_tricks),
        "landed": build_head_params(k_l, in_features, landed_cfg, 2),
        "stance": build_head_params(k_s, in_features, stance_cfg, 4),
    }

    head_order = ("trick_name", "landed", "stance")
    packed, out_cols, n_later = pack_hard_heads_params(params, head_order)
    forward = make_hard_heads_forward(head_order, out_cols, n_later)

    # Pure-JAX references (PyTorch-layout params).
    def ref_head(xv, ps, emulate_bf16):
        h = xv
        for i, (w, b) in enumerate(ps):
            wv = w
            if emulate_bf16:
                wv = w.astype(jnp.bfloat16).astype(jnp.float32)
                h = h.astype(jnp.bfloat16).astype(jnp.float32)
            h = h @ wv.T + b
            if i < len(ps) - 1:
                h = jnp.maximum(h, 0.0)
        return h

    def check(x, out):
        ref_bf16 = {k: ref_head(x, v, True) for k, v in params.items()}
        ref_f32 = {k: ref_head(x, v, False) for k, v in params.items()}
        for k in out:
            assert out[k].shape == ref_f32[k].shape, (k, out[k].shape)
            # Tight check vs a reference that mimics the kernel's bf16 numerics.
            assert jnp.allclose(out[k], ref_bf16[k], atol=2e-3, rtol=2e-3), k
            # Loose sanity check vs the full-f32 reference.
            assert jnp.allclose(out[k], ref_f32[k], atol=1e-1, rtol=1e-1), k

    # Small batch (grid-less path).
    x = jax.random.normal(k_x, (batch, in_features), jnp.float32)
    out = forward(x, packed)
    out = jax.tree_util.tree_map(jax.block_until_ready, out)
    check(x, out)
    assert out["trick_name"].shape == (batch, n_tricks)
    assert out["landed"].shape == (batch, 2)
    assert out["stance"].shape == (batch, 4)

    # Larger batch exercising the tiled / parallel-grid path.
    batch2 = 512
    x2 = jax.random.normal(k_x2, (batch2, in_features), jnp.float32)
    out2 = forward(x2, packed)
    out2 = jax.tree_util.tree_map(jax.block_until_ready, out2)
    check(x2, out2)
    assert out2["trick_name"].shape == (batch2, n_tricks)

    print("KERNEL_OK")
</pallas_src>

<mosaic_0001>
module attributes {stable_mosaic.version = 11 : i64} {
  func.func @kernel(%arg0: memref<16x32xf32, #tpu.memory_space<vmem>>, %arg1: memref<32x128xbf16, #tpu.memory_space<vmem>>, %arg2: memref<1x128xf32, #tpu.memory_space<vmem>>, %arg3: memref<2x128x128xbf16, #tpu.memory_space<vmem>>, %arg4: memref<2x1x128xf32, #tpu.memory_space<vmem>>, %arg5: memref<16x128xf32, #tpu.memory_space<vmem>>) attributes {dimension_semantics = [], scalar_prefetch = 0 : i64, scratch_operands = 0 : i64, tpu.core_type = #tpu.core_type<tc>} {
    %c0 = arith.constant 0 : index
    %c0_0 = arith.constant 0 : index
    %0 = vector.load %arg0[%c0, %c0_0] : memref<16x32xf32, #tpu.memory_space<vmem>>, vector<16x32xf32>
    %1 = arith.truncf %0 : vector<16x32xf32> to vector<16x32xbf16>
    %c0_1 = arith.constant 0 : index
    %c0_2 = arith.constant 0 : index
    %2 = vector.load %arg1[%c0_1, %c0_2] : memref<32x128xbf16, #tpu.memory_space<vmem>>, vector<32x128xbf16>
    %cst = arith.constant dense<0.000000e+00> : vector<16x128xf32>
    %3 = tpu.matmul %1, %2, %cst {dimension_numbers = #tpu.dot_dimension_numbers<[1], [0], [0], [1], [0, 0, 1, 1], [], []>} : vector<16x32xbf16>, vector<32x128xbf16>, vector<16x128xf32> -> vector<16x128xf32>
    %c0_3 = arith.constant 0 : index
    %c0_4 = arith.constant 0 : index
    %4 = vector.load %arg2[%c0_3, %c0_4] : memref<1x128xf32, #tpu.memory_space<vmem>>, vector<1x128xf32>
    %5 = vector.broadcast %4 : vector<1x128xf32> to vector<16x128xf32>
    %6 = arith.addf %3, %5 : vector<16x128xf32>
    %cst_5 = arith.constant 0.000000e+00 : f32
    %7 = vector.broadcast %cst_5 : f32 to vector<16x128xf32>
    %8 = arith.maximumf %6, %7 : vector<16x128xf32>
    %9 = arith.truncf %8 : vector<16x128xf32> to vector<16x128xbf16>
    %c0_6 = arith.constant 0 : index
    %c0_7 = arith.constant 0 : index
    %c0_8 = arith.constant 0 : index
    %10 = vector.load %arg3[%c0_6, %c0_7, %c0_8] : memref<2x128x128xbf16, #tpu.memory_space<vmem>>, vector<1x128x128xbf16>
    %11 = vector.shape_cast %10 : vector<1x128x128xbf16> to vector<128x128xbf16>
    %cst_9 = arith.constant dense<0.000000e+00> : vector<16x128xf32>
    %12 = tpu.matmul %9, %11, %cst_9 {dimension_numbers = #tpu.dot_dimension_numbers<[1], [0], [0], [1], [0, 0, 1, 1], [], []>} : vector<16x128xbf16>, vector<128x128xbf16>, vector<16x128xf32> -> vector<16x128xf32>
    %c0_10 = arith.constant 0 : index
    %c0_11 = arith.constant 0 : index
    %c0_12 = arith.constant 0 : index
    %13 = vector.load %arg4[%c0_10, %c0_11, %c0_12] : memref<2x1x128xf32, #tpu.memory_space<vmem>>, vector<1x1x128xf32>
    %14 = vector.shape_cast %13 : vector<1x1x128xf32> to vector<1x128xf32>
    %15 = vector.broadcast %14 : vector<1x128xf32> to vector<16x128xf32>
    %16 = arith.addf %12, %15 : vector<16x128xf32>
    %cst_13 = arith.constant 0.000000e+00 : f32
    %17 = vector.broadcast %cst_13 : f32 to vector<16x128xf32>
    %18 = arith.maximumf %16, %17 : vector<16x128xf32>
    %19 = arith.truncf %18 : vector<16x128xf32> to vector<16x128xbf16>
    %c1 = arith.constant 1 : index
    %c0_14 = arith.constant 0 : index
    %c0_15 = arith.constant 0 : index
    %20 = vector.load %arg3[%c1, %c0_14, %c0_15] : memref<2x128x128xbf16, #tpu.memory_space<vmem>>, vector<1x128x128xbf16>
    %21 = vector.shape_cast %20 : vector<1x128x128xbf16> to vector<128x128xbf16>
    %cst_16 = arith.constant dense<0.000000e+00> : vector<16x128xf32>
    %22 = tpu.matmul %19, %21, %cst_16 {dimension_numbers = #tpu.dot_dimension_numbers<[1], [0], [0], [1], [0, 0, 1, 1], [], []>} : vector<16x128xbf16>, vector<128x128xbf16>, vector<16x128xf32> -> vector<16x128xf32>
    %c1_17 = arith.constant 1 : index
    %c0_18 = arith.constant 0 : index
    %c0_19 = arith.constant 0 : index
    %23 = vector.load %arg4[%c1_17, %c0_18, %c0_19] : memref<2x1x128xf32, #tpu.memory_space<vmem>>, vector<1x1x128xf32>
    %24 = vector.shape_cast %23 : vector<1x1x128xf32> to vector<1x128xf32>
    %25 = vector.broadcast %24 : vector<1x128xf32> to vector<16x128xf32>
    %26 = arith.addf %22, %25 : vector<16x128xf32>
    %27 = arith.addf %16, %26 : vector<16x128xf32>
    %c0_20 = arith.constant 0 : index
    %c0_21 = arith.constant 0 : index
    %28 = vector.load %arg5[%c0_20, %c0_21] : memref<16x128xf32, #tpu.memory_space<vmem>>, vector<16x128xf32>
    tpu.vector_store %arg5[%c0_20, %c0_21], %27 {strides = array<i32>} : memref<16x128xf32, #tpu.memory_space<vmem>>, vector<16x128xf32>,
    return
  }
}

</mosaic_0001>

<bundles_post_ra>
// kernel: forward.1
= control target key start
LH: loop header
LB: loop body
LE: loop exit
PB: predicated region body
PF: predicated region fallthrough
CT: control target
= control target key end

     0   :  { %10 = vsyncpa [#allocation3], 0  ;;  %s684_s0 = inlined_call_operand.hbm [shape: f32[16,32], index: 0, kind: input, shape index: {}]   ;;  %s685_s1 = inlined_call_operand.hbm [shape: bf16[32,128], index: 1, kind: input, shape index: {}]   ;;  %s686_s2 = inlined_call_operand.vmem [shape: f32[1,128], index: 2, kind: input, shape index: {}]   ;;  %s687_s3 = inlined_call_operand.hbm [shape: bf16[2,128,128], index: 3, kind: input, shape index: {}]   ;;  %s688_s4 = inlined_call_operand.vmem [shape: f32[2,1,128], index: 4, kind: input, shape index: {}]   ;;  %s689_s5 = inlined_call_operand.vmem [shape: f32[16,128], index: 5, kind: output, shape index: {}]  }
   0x1   :  { %11 = vsyncpa [#allocation5], 0  ;;  %s564_s18 = smov [#allocation4]   ;;  %s494_s22 = scalar_lea.hbm %s685_s1, 256 }
   0x2   :  { %s29_s19 = sshll.u32 %s564_s18, 4  ;;  %p495_p0 = scmp.ne.s32.totalorder %s685_s1, %s494_s22  ;;  %s30_s19 = int_to_ptr.vmem [resolvable:$true] %s29_s19 }
   0x3   :  { %p498_p1 = scmp.lt.u32.totalorder %s494_s22, %s685_s1 }
   0x5   :  { %p500_p2 = pnand %p498_p1, %p495_p0 }
   0x7   :  { %503 = shalt.err (!%p500_p2)
}
   0x8   :  { %s504_s27 = scalar_lea.vmem %s30_s19, 256  ;;  %p509_p4 = scmp.lt.s32.totalorder %s30_s19, %s30_s19 }
   0x9   :  { %p505_p3 = scmp.ne.s32.totalorder %s30_s19, %s504_s27  ;;  %p510_p5 = scmp.lt.s32.totalorder %s504_s27, %s504_s27 }
   0xb   :  { %p511_p6 = por %p510_p5, %p509_p4 }
   0xd   :  { %p512_p7 = pnand %p511_p6, %p505_p3 }
   0xf   :  { %515 = shalt.err (!%p512_p7)
}
  0x10   :  { %s565_s28 = smov 64   ;;  %s566_s29 = smov 4  }
  0x11   :  { %35 = dma.hbm_to_vmem [thread:$0]  %s685_s1, 256, %s30_s19, [#allocation5], %s565_s28, %s565_s28, %s566_s29  }
  0x12   :  { %s567_s7 = smov [#allocation2]   ;;  %s516_s11 = scalar_lea.hbm %s684_s0, 256 }
  0x13   :  { %s17_s8 = sshll.u32 %s567_s7, 4  ;;  %p517_p8 = scmp.ne.s32.totalorder %s684_s0, %s516_s11  ;;  %s18_s8 = int_to_ptr.vmem [resolvable:$true] %s17_s8 }
  0x14   :  { %p520_p9 = scmp.lt.u32.totalorder %s516_s11, %s684_s0 }
  0x16   :  { %p522_p10 = pnand %p520_p9, %p517_p8 }
  0x18   :  { %525 = shalt.err (!%p522_p10)
}
  0x19   :  { %s526_s16 = scalar_lea.vmem %s18_s8, 256  ;;  %p531_p12 = scmp.lt.s32.totalorder %s18_s8, %s18_s8 }
  0x1a   :  { %p527_p11 = scmp.ne.s32.totalorder %s18_s8, %s526_s16  ;;  %p532_p13 = scmp.lt.s32.totalorder %s526_s16, %s526_s16 }
  0x1c   :  { %p533_p0 = por %p532_p13, %p531_p12 }
  0x1e   :  { %p534_p1 = pnand %p533_p0, %p527_p11 }
  0x20   :  { %537 = shalt.err (!%p534_p1)
}
  0x21   :  { %s568_s1 = smov 128   ;;  %s569_s17 = smov 8  }
  0x22   :  { %23 = dma.hbm_to_vmem [thread:$0]  %s684_s0, 256, %s18_s8, [#allocation3], %s568_s1, %s568_s1, %s569_s17  }
  0x23   :  { %s570_s20 = smov [#allocation6]   ;;  %s538_s24 = scalar_lea.hbm %s687_s3, 2048 }
  0x24   :  { %s43_s21 = sshll.u32 %s570_s20, 4  ;;  %p539_p2 = scmp.ne.s32.totalorder %s687_s3, %s538_s24  ;;  %s44_s21 = int_to_ptr.vmem [resolvable:$true] %s43_s21 }
  0x25   :  { %p542_p3 = scmp.lt.u32.totalorder %s538_s24, %s687_s3 }
  0x27   :  { %p544_p4 = pnand %p542_p3, %p539_p2 }
  0x29   :  { %547 = shalt.err (!%p544_p4)
}
  0x2a   :  { %s548_s6 = scalar_lea.vmem %s44_s21, 2048  ;;  %p553_p6 = scmp.lt.s32.totalorder %s44_s21, %s44_s21 }
  0x2b   :  { %p549_p5 = scmp.ne.s32.totalorder %s44_s21, %s548_s6  ;;  %p554_p7 = scmp.lt.s32.totalorder %s548_s6, %s548_s6 }
  0x2d   :  { %p555_p8 = por %p554_p7, %p553_p6 }
  0x2f   :  { %p556_p9 = pnand %p555_p8, %p549_p5 }
  0x31   :  { %559 = shalt.err (!%p556_p9)
}
  0x32   :  { %49 = dma.hbm_to_vmem [thread:$0]  %s687_s3, 2048, %s44_s21, [#allocation5], %s565_s28, %s565_s28, %s566_s29  }
  0x33   :  { %560 = dma.done.wait [#allocation3], 256  }
  0x34   :  { %561 = vsyncadd [#allocation3], 4294967040 }
  0x35   :  { %562 = dma.done.wait [#allocation5], 2304  }
  0x36   :  { %563 = vsyncadd [#allocation5], 4294964992  ;;  %v571_v0 = vmov 0.0   ;;  %vm572_vm0 = vmmov 0   ;;  %v476_v1 = vld [vmem:[#allocation4] sm:$0xff]   ;;  %v477_v2 = vld [vmem:[#allocation4 + $0x8] sm:$0xff]  }
  0x37   :  { %419 = vmatprep.subr.bf16.mxu0 %v571_v0  ;;  %423 = vmatprep.mubr.msk.bf16.mxu0 %vm572_vm0, %v571_v0  ;;  %v62_v3 = vld [vmem:[#allocation2] sm:$0xff]  ;;  %v63_v4 = vld [vmem:[#allocation2 + $0x8] sm:$0xff]  ;;  %vm88_vm1 = vcmask 261120   ;;  %v480_v8 = vld [vmem:[#allocation6 + $0x10] sm:$0xff]  }
  0x38   :  { %427 = vmatprep.subr.bf16.mxu1 %v571_v0  ;;  %443 = vmatprep.mubr.msk.bf16.mxu1 %vm572_vm0, %v571_v0  ;;  %v478_v5 = vld [vmem:[#allocation6] sm:$0xff]   ;;  %v64_v6 = vpack.c.bf16 %v63_v4, %v62_v3  ;;  %v479_v7 = vld [vmem:[#allocation6 + $0x8] sm:$0xff]   ;;  %v481_v9 = vld [vmem:[#allocation6 + $0x18] sm:$0xff]  }
  0x39   :  { %420 = vmatpush3.bf16.msra.mxu0 %v476_v1  ;;  %428 = vmatpush3.bf16.msra.mxu1 %v478_v5  ;;  %v482_v10 = vld [vmem:[#allocation6 + $0x20] sm:$0xff]   ;;  %v483_v11 = vld [vmem:[#allocation6 + $0x28] sm:$0xff]   ;;  %v484_v12 = vld [vmem:[#allocation6 + $0x30] sm:$0xff]  }
  0x3a   :  { %421 = vmatprep.subr.bf16.mxu0 %v571_v0  ;;  %429 = vmatprep.subr.bf16.mxu1 %v571_v0  ;;  %v485_v13 = vld [vmem:[#allocation6 + $0x38] sm:$0xff]   ;;  %v486_v14 = vld [vmem:[#allocation6 + $0x40] sm:$0xff]   ;;  %v487_v15 = vld [vmem:[#allocation6 + $0x48] sm:$0xff]  }
  0x3b   :  { %v488_v16 = vld [vmem:[#allocation6 + $0x50] sm:$0xff]   ;;  %v489_v17 = vld [vmem:[#allocation6 + $0x58] sm:$0xff]   ;;  %v490_v18 = vld [vmem:[#allocation6 + $0x60] sm:$0xff]  }
  0x3c   :  { %v491_v19 = vld [vmem:[#allocation6 + $0x68] sm:$0xff]   ;;  %v375_v20 = vld [vmem:[%s686_s2] ss:$0 sm:$0xff]  ;;  %v493_v31 = vld [vmem:[#allocation6 + $0x78] sm:$0xff]  }
  0x3d   :  { %422 = vmatpush3.bf16.msra.mxu0 %v477_v2  ;;  %430 = vmatpush3.bf16.msra.mxu1 %v479_v7  ;;  %v492_v30 = vld [vmem:[#allocation6 + $0x70] sm:$0xff]  }
  0x3e   :  { %447 = vmatprep.subr.bf16.mxu0 %v571_v0  ;;  %431 = vmatprep.subr.bf16.mxu1 %v571_v0  ;;  %v379_v32 = vld [vmem:[%s688_s4] ss:$0 sm:$0xff]  ;;  %v389_v42 = vld [vmem:[%s688_s4 + $0x1] ss:$0 sm:$0xff] }
  0x40   :  { %424 = vmatmul.mubr.msk.bf16.vlgmr.msra.gmra.mrb[0].mxu0 %vm88_vm1, %v64_v6 }
  0x41   :  { %463 = vmatprep.mubr.msk.bf16.mxu0 %vm572_vm0, %v571_v0  ;;  %432 = vmatpush3.bf16.msra.mxu1 %v480_v8 }
  0x42   :  { %433 = vmatprep.subr.bf16.mxu1 %v571_v0  ;;  %448 = vmatpush3.bf16.msra.mxu0 %v486_v14 }
  0x43   :  { %449 = vmatprep.subr.bf16.mxu0 %v571_v0 }
  0x45   :  { %434 = vmatpush3.bf16.msra.mxu1 %v481_v9 }
  0x46   :  { %435 = vmatprep.subr.bf16.mxu1 %v571_v0  ;;  %450 = vmatpush3.bf16.msra.mxu0 %v487_v15 }
  0x47   :  { %451 = vmatprep.subr.bf16.mxu0 %v571_v0 }
  0x49   :  { %436 = vmatpush3.bf16.msra.mxu1 %v482_v10 }
  0x4a   :  { %437 = vmatprep.subr.bf16.mxu1 %v571_v0  ;;  %452 = vmatpush3.bf16.msra.mxu0 %v488_v16 }
  0x4b   :  { %453 = vmatprep.subr.bf16.mxu0 %v571_v0 }
  0x4d   :  { %438 = vmatpush3.bf16.msra.mxu1 %v483_v11 }
  0x4e   :  { %439 = vmatprep.subr.bf16.mxu1 %v571_v0  ;;  %454 = vmatpush3.bf16.msra.mxu0 %v489_v17 }
  0x4f   :  { %455 = vmatprep.subr.bf16.mxu0 %v571_v0 }
  0x51   :  { %440 = vmatpush3.bf16.msra.mxu1 %v484_v12 }
  0x52   :  { %441 = vmatprep.subr.bf16.mxu1 %v571_v0  ;;  %456 = vmatpush3.bf16.msra.mxu0 %v490_v18 }
  0x53   :  { %457 = vmatprep.subr.bf16.mxu0 %v571_v0 }
  0x55   :  { %442 = vmatpush3.bf16.msra.mxu1 %v485_v13 }
  0x56   :  { %458 = vmatpush3.bf16.msra.mxu0 %v491_v19 }
  0x57   :  { %459 = vmatprep.subr.bf16.mxu0 %v571_v0 }
  0x5a   :  { %460 = vmatpush3.bf16.msra.mxu0 %v492_v30 }
  0x5b   :  { %461 = vmatprep.subr.bf16.mxu0 %v571_v0 }
  0x5e   :  { %462 = vmatpush3.bf16.msra.mxu0 %v493_v31 }
 0x113   :  { %v126_v21 = vpop.f32.mrb[0].mxu0 }
 0x114   :  { %v127_v22 = vadd.f32 %v375_v20, %v126_v21  ;;  %v425_v23 = vpop.f32.mrb[1].mxu0 }
 0x115   :  { %v129_v24 = vpop.f32.mrb[2].mxu0 }
 0x116   :  { %v130_v25 = vadd.f32 %v375_v20, %v129_v24  ;;  %v426_v26 = vpop.f32.mrb[3].mxu0  ;;  %v133_v27 = vmax.f32 %v127_v22, 0.0 }
 0x118   :  { %v134_v28 = vmax.f32 %v130_v25, 0.0 }
 0x11a   :  { %v135_v29 = vpack.c.bf16 %v134_v28, %v133_v27 }
 0x11c   :  { %444 = vmatmul.mubr.bf16.vlgmr.msra.gmra.mrb[0].mxu1 %v135_v29 }
 0x1ef   :  { %v241_v33 = vpop.f32.mrb[0].mxu1 }
 0x1f0   :  { %v242_v34 = vadd.f32 %v379_v32, %v241_v33  ;;  %v445_v35 = vpop.f32.mrb[1].mxu1 }
 0x1f1   :  { %v244_v36 = vpop.f32.mrb[2].mxu1 }
 0x1f2   :  { %v245_v37 = vadd.f32 %v379_v32, %v244_v36  ;;  %v446_v38 = vpop.f32.mrb[3].mxu1  ;;  %v248_v39 = vmax.f32 %v242_v34, 0.0 }
 0x1f4   :  { %v249_v40 = vmax.f32 %v245_v37, 0.0 }
 0x1f6   :  { %v250_v41 = vpack.c.bf16 %v249_v40, %v248_v39 }
 0x1f8   :  { %464 = vmatmul.mubr.bf16.vlgmr.msra.gmra.mrb[4].mxu0 %v250_v41 }
 0x2cb   :  { %v358_v43 = vpop.f32.mrb[4].mxu0 }
 0x2cc   :  { %v359_v44 = vadd.f32 %v389_v42, %v358_v43  ;;  %v465_v45 = vpop.f32.mrb[5].mxu0 }
 0x2cd   :  { %v361_v46 = vpop.f32.mrb[6].mxu0 }
 0x2ce   :  { %v365_v47 = vadd.f32 %v359_v44, %v242_v34  ;;  %v362_v48 = vadd.f32 %v389_v42, %v361_v46  ;;  %v466_v49 = vpop.f32.mrb[7].mxu0 }
 0x2d0   :  { %367 = vst [vmem:[%s689_s5] sm:$0xff] %v365_v47  ;;  %v366_v50 = vadd.f32 %v362_v48, %v245_v37 }
 0x2d2   :  { %368 = vst [vmem:[%s689_s5 + $0x8] sm:$0xff] %v366_v50 }
 0x2d3   :  { %373 = vsyncpa [#allocation3], 1 }
 0x2d4   :  { %374 = vsyncpa [#allocation5], 1 }

</bundles_post_ra>
